<compile_context>
chip_gen: v7x
topology: tpu7x:2x2x1
jax: 0.10.0
libtpu: 0.0.40
codegen_flags: <defaults>
</compile_context>

<pallas_src>
import functools

import jax
import jax.numpy as jnp
from jax import lax
from jax.experimental import pallas as pl
from jax.experimental.pallas import tpu as pltpu


def _soft_consistency_kernel(emb1_ref, emb2_ref, sq1_ref, sq2_ref, out_ref, *,
                             inv_t, row_tile, n_real, n_pad):
    """Per-row KL contributions for one tile of `row_tile` query rows."""
    i = pl.program_id(0)
    r0 = pl.multiple_of(i * row_tile, row_tile)

    need_mask = n_pad != n_real
    if need_mask:
        col = lax.broadcasted_iota(jnp.int32, (1, n_pad), 1)
        col_valid = col < n_real                                     # (1, N)

    def row_logits(emb_ref, sq_ref):
        # Resident full block (N, D); slice the current (tq, D) row tile.
        x_tile = emb_ref[pl.ds(r0, row_tile), :]                     # native dtype
        xf_tile = x_tile.astype(jnp.float32)
        sq_tile = jnp.sum(xf_tile * xf_tile, axis=1, keepdims=True)  # (tq, 1)
        # Both operands contract on D -> no explicit transpose before the MXU.
        gram = lax.dot_general(
            x_tile, emb_ref[...],
            dimension_numbers=(((1,), (1,)), ((), ())),
            preferred_element_type=jnp.float32)                      # (tq, N)
        # Column squared norms come in pre-transposed as (1, N) from the wrapper.
        d2 = jnp.maximum(sq_tile + sq_ref[...] - 2.0 * gram, 1e-12)
        logits = jnp.sqrt(d2) * inv_t
        if need_mask:
            logits = jnp.where(col_valid, logits, -1e30)
        return logits

    logits_in = row_logits(emb1_ref, sq1_ref)   # rows of d(emb1, emb1) / T
    logits_tg = row_logits(emb2_ref, sq2_ref)   # rows of d(emb2, emb2) / T

    # inputs = log_softmax(logits_in): only its per-row LSE is needed.
    m_in = jnp.max(logits_in, axis=1, keepdims=True)
    lse_in = m_in + jnp.log(jnp.sum(jnp.exp(logits_in - m_in),
                                    axis=1, keepdims=True))

    # targets: a single exp, reused for the normalizer and the KL numerator.
    m_tg = jnp.max(logits_tg, axis=1, keepdims=True)
    p_un = jnp.exp(logits_tg - m_tg)                                 # (tq, N)
    s_tg = jnp.sum(p_un, axis=1, keepdims=True)                      # (tq, 1)
    lse_tg = m_tg + jnp.log(s_tg)

    # KL per row:  sum_j q (log q - log p)
    #            = sum_j p_un*(logits_tg - logits_in)/S + lse_in - lse_tg
    # (masked columns contribute 0*0; exact division on (tq,1) scalars).
    num = jnp.sum(p_un * (logits_tg - logits_in), axis=1, keepdims=True)
    row_kl = num / s_tg + (lse_in - lse_tg)                          # (tq, 1)

    out_ref[...] = row_kl.reshape(1, 1, row_tile)                    # lane-dense


def _vmem_budget_bytes():
    try:
        cap = int(pltpu.get_tpu_info().vmem_capacity_bytes)
    except Exception:
        cap = 64 * 1024 * 1024          # conservative (v7x-sized) default
    # ~48 MiB on v7x (64 MiB / TC), ~96 MiB on v5e / v6e (128 MiB physical).
    return min(cap * 3 // 4, 96 * 1024 * 1024)


def _plan(n, d, itemsize, row_tile, budget):
    """Pick (n_pad, row_tile) so resident blocks + live slabs fit the budget."""
    if row_tile is not None:
        rt = int(row_tile)
        return -(-n // rt) * rt, rt
    if n <= 256:
        return n, n                      # single tile, no padding needed
    n_pad = -(-n // 128) * 128           # keep the lane dim a multiple of 128
    # Residents (worst case: double-buffered embs) + the two (1, N) sq inputs.
    resident = 2 * n_pad * d * itemsize * 2 + 4 * n_pad * 4
    k_live = 6                           # logits_in/tg, p_un + headroom temps
    avail = max(budget - resident, 4 * 1024 * 1024)
    rt_max = avail // (k_live * n_pad * 4)
    for cand in (512, 384, 256, 128):
        if n_pad % cand == 0 and cand <= rt_max:
            return n_pad, cand
    return n_pad, 128


def soft_consistency_loss(emb1, emb2, label=None, temperature=1.0,
                          row_tile=None):
    """Pallas implementation of SoftConsistencyLoss.forward.

    `label` is accepted (mirrors the PyTorch API) but unused, exactly as in
    the original module's forward.
    """
    assert emb1.shape == emb2.shape and emb1.ndim == 2
    n, d = emb1.shape
    budget = _vmem_budget_bytes()
    n_pad, rt = _plan(n, d, emb1.dtype.itemsize, row_tile, budget)
    num_tiles = n_pad // rt

    if n_pad != n:
        pad = ((0, n_pad - n), (0, 0))
        emb1 = jnp.pad(emb1, pad)
        emb2 = jnp.pad(emb2, pad)

    # Hoisted f32 squared row norms: one O(N*D) pass each, outside the grid.
    sq1 = jnp.sum(emb1.astype(jnp.float32) ** 2, axis=1)[None, :]    # (1, n_pad)
    sq2 = jnp.sum(emb2.astype(jnp.float32) ** 2, axis=1)[None, :]

    kernel = functools.partial(
        _soft_consistency_kernel, inv_t=1.0 / float(temperature),
        row_tile=rt, n_real=n, n_pad=n_pad)

    def run(single_buffer_residents):
        resident_kw = (dict(pipeline_mode=pl.Buffered(1))
                       if single_buffer_residents else {})
        call = pl.pallas_call(
            kernel,
            out_shape=jax.ShapeDtypeStruct((num_tiles, 1, rt), jnp.float32),
            grid_spec=pltpu.PrefetchScalarGridSpec(
                num_scalar_prefetch=0,
                grid=(num_tiles,),
                in_specs=[
                    pl.BlockSpec((n_pad, d), lambda i: (0, 0), **resident_kw),
                    pl.BlockSpec((n_pad, d), lambda i: (0, 0), **resident_kw),
                    pl.BlockSpec((1, n_pad), lambda i: (0, 0), **resident_kw),
                    pl.BlockSpec((1, n_pad), lambda i: (0, 0), **resident_kw),
                ],
                out_specs=pl.BlockSpec((1, 1, rt), lambda i: (i, 0, 0)),
            ),
            compiler_params=pltpu.CompilerParams(
                dimension_semantics=("parallel",),   # row tiles are independent
                vmem_limit_bytes=int(budget),
            ),
        )
        return call(emb1, emb2, sq1, sq2)

    try:
        # Constant-index residents gain nothing from double buffering; request
        # a single buffer (halves their VMEM footprint — matters on v7x's
        # 64 MiB).  Fall back if this JAX build rejects Buffered(1).
        row_kl = run(True)
        row_kl.block_until_ready()
    except Exception:
        row_kl = run(False)

    # Drop padded rows; KLDivLoss(reduction='batchmean') divides by real N.
    return jnp.sum(row_kl.reshape(-1)[:n]) / jnp.float32(n)


def _reference(emb1, emb2, temperature=1.0):
    # Pure-JAX reference of the PyTorch module, for correctness cross-check.
    def dist(x):
        sq = jnp.sum(x * x, axis=1, keepdims=True)
        d = sq + sq.T - 2.0 * (x @ x.T)
        return jnp.sqrt(jnp.clip(d, 1e-12))

    log_p = jax.nn.log_softmax(dist(emb1) / temperature, axis=1)
    q = jax.nn.softmax(dist(emb2) / temperature, axis=1)
    return jnp.sum(q * (jnp.log(q) - log_p)) / emb1.shape[0]


if __name__ == "__main__":
    key = jax.random.PRNGKey(0)
    k1, k2, k3, k4, k5, k6 = jax.random.split(key, 6)

    # Case 1: module-sized problem (batch of 8 embeddings, hidden=32).
    N, D = 8, 32
    emb1 = jax.random.normal(k1, (N, D), dtype=jnp.float32)
    emb2 = jax.random.normal(k2, (N, D), dtype=jnp.float32)
    label = jnp.arange(N, dtype=jnp.int32)   # unused, mirrors the PyTorch API
    loss = soft_consistency_loss(emb1, emb2, label, temperature=1.0)
    jax.block_until_ready(loss)
    ref = _reference(emb1, emb2, temperature=1.0)
    assert jnp.allclose(loss, ref, rtol=1e-5, atol=1e-5), (loss, ref)

    # Case 2: multi-tile (row-tiled, parallel-grid) path.
    e1 = jax.random.normal(k3, (32, 32), dtype=jnp.float32)
    e2 = jax.random.normal(k4, (32, 32), dtype=jnp.float32)
    loss2 = soft_consistency_loss(e1, e2, None, temperature=2.0, row_tile=8)
    jax.block_until_ready(loss2)
    ref2 = _reference(e1, e2, temperature=2.0)
    assert jnp.allclose(loss2, ref2, rtol=1e-5, atol=1e-5), (loss2, ref2)

    # Case 3: awkward N -> padded-rows + masked-columns path (N=20, pad to 24).
    f1 = jax.random.normal(k5, (20, 32), dtype=jnp.float32)
    f2 = jax.random.normal(k6, (20, 32), dtype=jnp.float32)
    loss3 = soft_consistency_loss(f1, f2, None, temperature=1.5, row_tile=8)
    jax.block_until_ready(loss3)
    ref3 = _reference(f1, f2, temperature=1.5)
    assert jnp.allclose(loss3, ref3, rtol=1e-5, atol=1e-5), (loss3, ref3)

    print("KERNEL_OK")
</pallas_src>

<mosaic_0001>
module attributes {stable_mosaic.version = 11 : i64} {
  func.func @_soft_consistency_kernel(%arg0: i32, %arg1: memref<8x32xf32, #tpu.memory_space<vmem>>, %arg2: memref<8x32xf32, #tpu.memory_space<vmem>>, %arg3: memref<1x8xf32, #tpu.memory_space<vmem>>, %arg4: memref<1x8xf32, #tpu.memory_space<vmem>>, %arg5: memref<1x1x8xf32, #tpu.memory_space<vmem>>) attributes {dimension_semantics = [#tpu.dimension_semantics<parallel>], iteration_bounds = array<i64: 1>, scalar_prefetch = 0 : i64, scratch_operands = 0 : i64, tpu.core_type = #tpu.core_type<tc>, window_params = [{pipeline_mode = #tpu.pipeline_mode<synchronous>, transform_indices = @transform_0, window_bounds = array<i64: 8, 32>}, {pipeline_mode = #tpu.pipeline_mode<synchronous>, transform_indices = @transform_1, window_bounds = array<i64: 8, 32>}, {pipeline_mode = #tpu.pipeline_mode<synchronous>, transform_indices = @transform_2, window_bounds = array<i64: 1, 8>}, {pipeline_mode = #tpu.pipeline_mode<synchronous>, transform_indices = @transform_3, window_bounds = array<i64: 1, 8>}, {transform_indices = @transform_4, window_bounds = array<i64: 1, 1, 8>}]} {
    %c8_i32 = arith.constant 8 : i32
    %0 = arith.muli %arg0, %c8_i32 : i32
    %1 = tpu.assume_multiple %0, 8 : i32
    %2 = arith.index_cast %1 : i32 to index
    %c0 = arith.constant 0 : index
    %3 = vector.load %arg1[%2, %c0] : memref<8x32xf32, #tpu.memory_space<vmem>>, vector<8x32xf32>
    %4 = arith.mulf %3, %3 : vector<8x32xf32>
    %cst = arith.constant dense<0.000000e+00> : vector<8xf32>
    %5 = vector.multi_reduction <add>, %4, %cst [1] : vector<8x32xf32> to vector<8xf32>
    %6 = vector.shape_cast %5 : vector<8xf32> to vector<8x1xf32>
    %c0_0 = arith.constant 0 : index
    %c0_1 = arith.constant 0 : index
    %7 = vector.load %arg1[%c0_0, %c0_1] : memref<8x32xf32, #tpu.memory_space<vmem>>, vector<8x32xf32>
    %cst_2 = arith.constant dense<0.000000e+00> : vector<8x8xf32>
    %8 = tpu.matmul %3, %7, %cst_2 {dimension_numbers = #tpu.dot_dimension_numbers<[1], [1], [0], [0], [0, 0, 1, 0], [], []>} : vector<8x32xf32>, vector<8x32xf32>, vector<8x8xf32> -> vector<8x8xf32>
    %c0_3 = arith.constant 0 : index
    %c0_4 = arith.constant 0 : index
    %9 = vector.load %arg3[%c0_3, %c0_4] : memref<1x8xf32, #tpu.memory_space<vmem>>, vector<1x8xf32>
    %10 = vector.broadcast %6 : vector<8x1xf32> to vector<8x8xf32>
    %11 = vector.broadcast %9 : vector<1x8xf32> to vector<8x8xf32>
    %12 = arith.addf %10, %11 : vector<8x8xf32>
    %cst_5 = arith.constant 2.000000e+00 : f32
    %13 = vector.broadcast %cst_5 : f32 to vector<8x8xf32>
    %14 = arith.mulf %13, %8 : vector<8x8xf32>
    %15 = arith.subf %12, %14 : vector<8x8xf32>
    %cst_6 = arith.constant 9.99999996E-13 : f32
    %16 = vector.broadcast %cst_6 : f32 to vector<8x8xf32>
    %17 = arith.maximumf %15, %16 : vector<8x8xf32>
    %18 = math.sqrt %17 : vector<8x8xf32>
    %cst_7 = arith.constant 1.000000e+00 : f32
    %19 = vector.broadcast %cst_7 : f32 to vector<8x8xf32>
    %20 = arith.mulf %18, %19 : vector<8x8xf32>
    %21 = arith.index_cast %1 : i32 to index
    %c0_8 = arith.constant 0 : index
    %22 = vector.load %arg2[%21, %c0_8] : memref<8x32xf32, #tpu.memory_space<vmem>>, vector<8x32xf32>
    %23 = arith.mulf %22, %22 : vector<8x32xf32>
    %cst_9 = arith.constant dense<0.000000e+00> : vector<8xf32>
    %24 = vector.multi_reduction <add>, %23, %cst_9 [1] : vector<8x32xf32> to vector<8xf32>
    %25 = vector.shape_cast %24 : vector<8xf32> to vector<8x1xf32>
    %c0_10 = arith.constant 0 : index
    %c0_11 = arith.constant 0 : index
    %26 = vector.load %arg2[%c0_10, %c0_11] : memref<8x32xf32, #tpu.memory_space<vmem>>, vector<8x32xf32>
    %cst_12 = arith.constant dense<0.000000e+00> : vector<8x8xf32>
    %27 = tpu.matmul %22, %26, %cst_12 {dimension_numbers = #tpu.dot_dimension_numbers<[1], [1], [0], [0], [0, 0, 1, 0], [], []>} : vector<8x32xf32>, vector<8x32xf32>, vector<8x8xf32> -> vector<8x8xf32>
    %c0_13 = arith.constant 0 : index
    %c0_14 = arith.constant 0 : index
    %28 = vector.load %arg4[%c0_13, %c0_14] : memref<1x8xf32, #tpu.memory_space<vmem>>, vector<1x8xf32>
    %29 = vector.broadcast %25 : vector<8x1xf32> to vector<8x8xf32>
    %30 = vector.broadcast %28 : vector<1x8xf32> to vector<8x8xf32>
    %31 = arith.addf %29, %30 : vector<8x8xf32>
    %cst_15 = arith.constant 2.000000e+00 : f32
    %32 = vector.broadcast %cst_15 : f32 to vector<8x8xf32>
    %33 = arith.mulf %32, %27 : vector<8x8xf32>
    %34 = arith.subf %31, %33 : vector<8x8xf32>
    %cst_16 = arith.constant 9.99999996E-13 : f32
    %35 = vector.broadcast %cst_16 : f32 to vector<8x8xf32>
    %36 = arith.maximumf %34, %35 : vector<8x8xf32>
    %37 = math.sqrt %36 : vector<8x8xf32>
    %cst_17 = arith.constant 1.000000e+00 : f32
    %38 = vector.broadcast %cst_17 : f32 to vector<8x8xf32>
    %39 = arith.mulf %37, %38 : vector<8x8xf32>
    %cst_18 = arith.constant dense<0xFF800000> : vector<8xf32>
    %40 = vector.multi_reduction <maximumf>, %20, %cst_18 [1] : vector<8x8xf32> to vector<8xf32>
    %41 = vector.shape_cast %40 : vector<8xf32> to vector<8x1xf32>
    %42 = vector.broadcast %41 : vector<8x1xf32> to vector<8x8xf32>
    %43 = arith.subf %20, %42 : vector<8x8xf32>
    %44 = math.exp %43 : vector<8x8xf32>
    %cst_19 = arith.constant dense<0.000000e+00> : vector<8xf32>
    %45 = vector.multi_reduction <add>, %44, %cst_19 [1] : vector<8x8xf32> to vector<8xf32>
    %46 = vector.shape_cast %45 : vector<8xf32> to vector<8x1xf32>
    %47 = math.log %46 : vector<8x1xf32>
    %48 = arith.addf %41, %47 : vector<8x1xf32>
    %cst_20 = arith.constant dense<0xFF800000> : vector<8xf32>
    %49 = vector.multi_reduction <maximumf>, %39, %cst_20 [1] : vector<8x8xf32> to vector<8xf32>
    %50 = vector.shape_cast %49 : vector<8xf32> to vector<8x1xf32>
    %51 = vector.broadcast %50 : vector<8x1xf32> to vector<8x8xf32>
    %52 = arith.subf %39, %51 : vector<8x8xf32>
    %53 = math.exp %52 : vector<8x8xf32>
    %cst_21 = arith.constant dense<0.000000e+00> : vector<8xf32>
    %54 = vector.multi_reduction <add>, %53, %cst_21 [1] : vector<8x8xf32> to vector<8xf32>
    %55 = vector.shape_cast %54 : vector<8xf32> to vector<8x1xf32>
    %56 = math.log %55 : vector<8x1xf32>
    %57 = arith.addf %50, %56 : vector<8x1xf32>
    %58 = arith.subf %39, %20 : vector<8x8xf32>
    %59 = arith.mulf %53, %58 : vector<8x8xf32>
    %cst_22 = arith.constant dense<0.000000e+00> : vector<8xf32>
    %60 = vector.multi_reduction <add>, %59, %cst_22 [1] : vector<8x8xf32> to vector<8xf32>
    %61 = vector.shape_cast %60 : vector<8xf32> to vector<8x1xf32>
    %62 = arith.divf %61, %55 : vector<8x1xf32>
    %63 = arith.subf %48, %57 : vector<8x1xf32>
    %64 = arith.addf %62, %63 : vector<8x1xf32>
    %65 = vector.shape_cast %64 : vector<8x1xf32> to vector<1x1x8xf32>
    %c0_23 = arith.constant 0 : index
    %c0_24 = arith.constant 0 : index
    %c0_25 = arith.constant 0 : index
    %66 = vector.load %arg5[%c0_23, %c0_24, %c0_25] : memref<1x1x8xf32, #tpu.memory_space<vmem>>, vector<1x1x8xf32>
    tpu.vector_store %arg5[%c0_23, %c0_24, %c0_25], %65 {strides = array<i32>} : memref<1x1x8xf32, #tpu.memory_space<vmem>>, vector<1x1x8xf32>,
    return
  }
  func.func @transform_0(%arg0: i32) -> (i32, i32) {
    %c0_i32 = arith.constant 0 : i32
    %c0_i32_0 = arith.constant 0 : i32
    %c0_i32_1 = arith.constant 0 : i32
    return %c0_i32, %c0_i32_0 : i32, i32
  }
  func.func @transform_1(%arg0: i32) -> (i32, i32) {
    %c0_i32 = arith.constant 0 : i32
    %c0_i32_0 = arith.constant 0 : i32
    %c0_i32_1 = arith.constant 0 : i32
    return %c0_i32, %c0_i32_0 : i32, i32
  }
  func.func @transform_2(%arg0: i32) -> (i32, i32) {
    %c0_i32 = arith.constant 0 : i32
    %c0_i32_0 = arith.constant 0 : i32
    %c0_i32_1 = arith.constant 0 : i32
    return %c0_i32, %c0_i32_0 : i32, i32
  }
  func.func @transform_3(%arg0: i32) -> (i32, i32) {
    %c0_i32 = arith.constant 0 : i32
    %c0_i32_0 = arith.constant 0 : i32
    %c0_i32_1 = arith.constant 0 : i32
    return %c0_i32, %c0_i32_0 : i32, i32
  }
  func.func @transform_4(%arg0: i32) -> (i32, i32, i32) {
    %c0_i32 = arith.constant 0 : i32
    %c0_i32_0 = arith.constant 0 : i32
    %c0_i32_1 = arith.constant 0 : i32
    return %arg0, %c0_i32, %c0_i32_0 : i32, i32, i32
  }
}

module attributes {stable_mosaic.version = 11 : i64} {
  func.func @_soft_consistency_kernel(%arg0: i32, %arg1: memref<8x32xf32, #tpu.memory_space<vmem>>, %arg2: memref<8x32xf32, #tpu.memory_space<vmem>>, %arg3: memref<1x8xf32, #tpu.memory_space<vmem>>, %arg4: memref<1x8xf32, #tpu.memory_space<vmem>>, %arg5: memref<1x1x8xf32, #tpu.memory_space<vmem>>) attributes {dimension_semantics = [#tpu.dimension_semantics<parallel>], iteration_bounds = array<i64: 1>, scalar_prefetch = 0 : i64, scratch_operands = 0 : i64, tpu.core_type = #tpu.core_type<tc>, window_params = [{pipeline_mode = #tpu.pipeline_mode<synchronous>, transform_indices = @transform_0, window_bounds = array<i64: 8, 32>}, {pipeline_mode = #tpu.pipeline_mode<synchronous>, transform_indices = @transform_1, window_bounds = array<i64: 8, 32>}, {pipeline_mode = #tpu.pipeline_mode<synchronous>, transform_indices = @transform_2, window_bounds = array<i64: 1, 8>}, {pipeline_mode = #tpu.pipeline_mode<synchronous>, transform_indices = @transform_3, window_bounds = array<i64: 1, 8>}, {transform_indices = @transform_4, window_bounds = array<i64: 1, 1, 8>}]} {
    %c8_i32 = arith.constant 8 : i32
    %0 = arith.muli %arg0, %c8_i32 : i32
    %1 = tpu.assume_multiple %0, 8 : i32
    %2 = arith.index_cast %1 : i32 to index
    %c0 = arith.constant 0 : index
    %3 = vector.load %arg1[%2, %c0] : memref<8x32xf32, #tpu.memory_space<vmem>>, vector<8x32xf32>
    %4 = arith.mulf %3, %3 : vector<8x32xf32>
    %cst = arith.constant dense<0.000000e+00> : vector<8xf32>
    %5 = vector.multi_reduction <add>, %4, %cst [1] : vector<8x32xf32> to vector<8xf32>
    %6 = vector.shape_cast %5 : vector<8xf32> to vector<8x1xf32>
    %c0_0 = arith.constant 0 : index
    %c0_1 = arith.constant 0 : index
    %7 = vector.load %arg1[%c0_0, %c0_1] : memref<8x32xf32, #tpu.memory_space<vmem>>, vector<8x32xf32>
    %cst_2 = arith.constant dense<0.000000e+00> : vector<8x8xf32>
    %8 = tpu.matmul %3, %7, %cst_2 {dimension_numbers = #tpu.dot_dimension_numbers<[1], [1], [0], [0], [0, 0, 1, 0], [], []>} : vector<8x32xf32>, vector<8x32xf32>, vector<8x8xf32> -> vector<8x8xf32>
    %c0_3 = arith.constant 0 : index
    %c0_4 = arith.constant 0 : index
    %9 = vector.load %arg3[%c0_3, %c0_4] : memref<1x8xf32, #tpu.memory_space<vmem>>, vector<1x8xf32>
    %10 = vector.broadcast %6 : vector<8x1xf32> to vector<8x8xf32>
    %11 = vector.broadcast %9 : vector<1x8xf32> to vector<8x8xf32>
    %12 = arith.addf %10, %11 : vector<8x8xf32>
    %cst_5 = arith.constant 2.000000e+00 : f32
    %13 = vector.broadcast %cst_5 : f32 to vector<8x8xf32>
    %14 = arith.mulf %13, %8 : vector<8x8xf32>
    %15 = arith.subf %12, %14 : vector<8x8xf32>
    %cst_6 = arith.constant 9.99999996E-13 : f32
    %16 = vector.broadcast %cst_6 : f32 to vector<8x8xf32>
    %17 = arith.maximumf %15, %16 : vector<8x8xf32>
    %18 = math.sqrt %17 : vector<8x8xf32>
    %cst_7 = arith.constant 1.000000e+00 : f32
    %19 = vector.broadcast %cst_7 : f32 to vector<8x8xf32>
    %20 = arith.mulf %18, %19 : vector<8x8xf32>
    %21 = arith.index_cast %1 : i32 to index
    %c0_8 = arith.constant 0 : index
    %22 = vector.load %arg2[%21, %c0_8] : memref<8x32xf32, #tpu.memory_space<vmem>>, vector<8x32xf32>
    %23 = arith.mulf %22, %22 : vector<8x32xf32>
    %cst_9 = arith.constant dense<0.000000e+00> : vector<8xf32>
    %24 = vector.multi_reduction <add>, %23, %cst_9 [1] : vector<8x32xf32> to vector<8xf32>
    %25 = vector.shape_cast %24 : vector<8xf32> to vector<8x1xf32>
    %c0_10 = arith.constant 0 : index
    %c0_11 = arith.constant 0 : index
    %26 = vector.load %arg2[%c0_10, %c0_11] : memref<8x32xf32, #tpu.memory_space<vmem>>, vector<8x32xf32>
    %cst_12 = arith.constant dense<0.000000e+00> : vector<8x8xf32>
    %27 = tpu.matmul %22, %26, %cst_12 {dimension_numbers = #tpu.dot_dimension_numbers<[1], [1], [0], [0], [0, 0, 1, 0], [], []>} : vector<8x32xf32>, vector<8x32xf32>, vector<8x8xf32> -> vector<8x8xf32>
    %c0_13 = arith.constant 0 : index
    %c0_14 = arith.constant 0 : index
    %28 = vector.load %arg4[%c0_13, %c0_14] : memref<1x8xf32, #tpu.memory_space<vmem>>, vector<1x8xf32>
    %29 = vector.broadcast %25 : vector<8x1xf32> to vector<8x8xf32>
    %30 = vector.broadcast %28 : vector<1x8xf32> to vector<8x8xf32>
    %31 = arith.addf %29, %30 : vector<8x8xf32>
    %cst_15 = arith.constant 2.000000e+00 : f32
    %32 = vector.broadcast %cst_15 : f32 to vector<8x8xf32>
    %33 = arith.mulf %32, %27 : vector<8x8xf32>
    %34 = arith.subf %31, %33 : vector<8x8xf32>
    %cst_16 = arith.constant 9.99999996E-13 : f32
    %35 = vector.broadcast %cst_16 : f32 to vector<8x8xf32>
    %36 = arith.maximumf %34, %35 : vector<8x8xf32>
    %37 = math.sqrt %36 : vector<8x8xf32>
    %cst_17 = arith.constant 1.000000e+00 : f32
    %38 = vector.broadcast %cst_17 : f32 to vector<8x8xf32>
    %39 = arith.mulf %37, %38 : vector<8x8xf32>
    %cst_18 = arith.constant dense<0xFF800000> : vector<8xf32>
    %40 = vector.multi_reduction <maximumf>, %20, %cst_18 [1] : vector<8x8xf32> to vector<8xf32>
    %41 = vector.shape_cast %40 : vector<8xf32> to vector<8x1xf32>
    %42 = vector.broadcast %41 : vector<8x1xf32> to vector<8x8xf32>
    %43 = arith.subf %20, %42 : vector<8x8xf32>
    %44 = math.exp %43 : vector<8x8xf32>
    %cst_19 = arith.constant dense<0.000000e+00> : vector<8xf32>
    %45 = vector.multi_reduction <add>, %44, %cst_19 [1] : vector<8x8xf32> to vector<8xf32>
    %46 = vector.shape_cast %45 : vector<8xf32> to vector<8x1xf32>
    %47 = math.log %46 : vector<8x1xf32>
    %48 = arith.addf %41, %47 : vector<8x1xf32>
    %cst_20 = arith.constant dense<0xFF800000> : vector<8xf32>
    %49 = vector.multi_reduction <maximumf>, %39, %cst_20 [1] : vector<8x8xf32> to vector<8xf32>
    %50 = vector.shape_cast %49 : vector<8xf32> to vector<8x1xf32>
    %51 = vector.broadcast %50 : vector<8x1xf32> to vector<8x8xf32>
    %52 = arith.subf %39, %51 : vector<8x8xf32>
    %53 = math.exp %52 : vector<8x8xf32>
    %cst_21 = arith.constant dense<0.000000e+00> : vector<8xf32>
    %54 = vector.multi_reduction <add>, %53, %cst_21 [1] : vector<8x8xf32> to vector<8xf32>
    %55 = vector.shape_cast %54 : vector<8xf32> to vector<8x1xf32>
    %56 = math.log %55 : vector<8x1xf32>
    %57 = arith.addf %50, %56 : vector<8x1xf32>
    %58 = arith.subf %39, %20 : vector<8x8xf32>
    %59 = arith.mulf %53, %58 : vector<8x8xf32>
    %cst_22 = arith.constant dense<0.000000e+00> : vector<8xf32>
    %60 = vector.multi_reduction <add>, %59, %cst_22 [1] : vector<8x8xf32> to vector<8xf32>
    %61 = vector.shape_cast %60 : vector<8xf32> to vector<8x1xf32>
    %62 = arith.divf %61, %55 : vector<8x1xf32>
    %63 = arith.subf %48, %57 : vector<8x1xf32>
    %64 = arith.addf %62, %63 : vector<8x1xf32>
    %65 = vector.shape_cast %64 : vector<8x1xf32> to vector<1x1x8xf32>
    %c0_23 = arith.constant 0 : index
    %c0_24 = arith.constant 0 : index
    %c0_25 = arith.constant 0 : index
    %66 = vector.load %arg5[%c0_23, %c0_24, %c0_25] : memref<1x1x8xf32, #tpu.memory_space<vmem>>, vector<1x1x8xf32>
    tpu.vector_store %arg5[%c0_23, %c0_24, %c0_25], %65 {strides = array<i32>} : memref<1x1x8xf32, #tpu.memory_space<vmem>>, vector<1x1x8xf32>,
    return
  }
  func.func @transform_0(%arg0: i32) -> (i32, i32) {
    %c0_i32 = arith.constant 0 : i32
    %c0_i32_0 = arith.constant 0 : i32
    %c0_i32_1 = arith.constant 0 : i32
    return %c0_i32, %c0_i32_0 : i32, i32
  }
  func.func @transform_1(%arg0: i32) -> (i32, i32) {
    %c0_i32 = arith.constant 0 : i32
    %c0_i32_0 = arith.constant 0 : i32
    %c0_i32_1 = arith.constant 0 : i32
    return %c0_i32, %c0_i32_0 : i32, i32
  }
  func.func @transform_2(%arg0: i32) -> (i32, i32) {
    %c0_i32 = arith.constant 0 : i32
    %c0_i32_0 = arith.constant 0 : i32
    %c0_i32_1 = arith.constant 0 : i32
    return %c0_i32, %c0_i32_0 : i32, i32
  }
  func.func @transform_3(%arg0: i32) -> (i32, i32) {
    %c0_i32 = arith.constant 0 : i32
    %c0_i32_0 = arith.constant 0 : i32
    %c0_i32_1 = arith.constant 0 : i32
    return %c0_i32, %c0_i32_0 : i32, i32
  }
  func.func @transform_4(%arg0: i32) -> (i32, i32, i32) {
    %c0_i32 = arith.constant 0 : i32
    %c0_i32_0 = arith.constant 0 : i32
    %c0_i32_1 = arith.constant 0 : i32
    return %arg0, %c0_i32, %c0_i32_0 : i32, i32, i32
  }
}

</mosaic_0001>

<bundles_post_ra>
// kernel: tpu_custom_call.1
= control target key start
LH: loop header
LB: loop body
LE: loop exit
PB: predicated region body
PF: predicated region fallthrough
CT: control target
= control target key end

     0   :  { %9 = vsyncpa [#allocation3], 0  ;;  %s494_s0 = inlined_call_operand.hbm [shape: f32[8,32], index: 0, kind: input, shape index: {}]   ;;  %s495_s1 = inlined_call_operand.hbm [shape: f32[8,32], index: 1, kind: input, shape index: {}]   ;;  %s496_s2 = inlined_call_operand.vmem [shape: f32[1,8], index: 2, kind: input, shape index: {}]   ;;  %s497_s3 = inlined_call_operand.vmem [shape: f32[1,8], index: 3, kind: input, shape index: {}]   ;;  %s498_s4 = inlined_call_operand.hbm [shape: f32[1,1,8], index: 4, kind: output, shape index: {}]  }
   0x1   :  { %10 = vsyncpa [#allocation6], 0 }
   0x2   :  { %11 = vsyncpa [#allocation4], 0  ;;  %s417_s15 = smov [#allocation2]   ;;  %s418_s17 = smov [#allocation5]  }
   0x3   :  { %s18_s16 = sshll.u32 %s417_s15, 4  ;;  %s28_s18 = sshll.u32 %s418_s17, 4  ;;  %s19_s16 = int_to_ptr.vmem [resolvable:$true] %s18_s16  ;;  %s29_s18 = int_to_ptr.vmem [resolvable:$true] %s28_s18 }
   0x4   :  { %s345_s21 = scalar_lea.hbm %s494_s0, 128 }
   0x5   :  { %p346_p0 = scmp.ne.s32.totalorder %s494_s0, %s345_s21  ;;  %p349_p1 = scmp.lt.u32.totalorder %s345_s21, %s494_s0 }
   0x7   :  { %p351_p2 = pnand %p349_p1, %p346_p0 }
   0x9   :  { %354 = shalt.err (!%p351_p2)
}
   0xa   :  { %s355_s26 = scalar_lea.vmem %s19_s16, 128  ;;  %p360_p4 = scmp.lt.s32.totalorder %s19_s16, %s19_s16 }
   0xb   :  { %p356_p3 = scmp.ne.s32.totalorder %s19_s16, %s355_s26  ;;  %p361_p5 = scmp.lt.s32.totalorder %s355_s26, %s355_s26 }
   0xd   :  { %p362_p6 = por %p361_p5, %p360_p4 }
   0xf   :  { %p363_p7 = pnand %p362_p6, %p356_p3 }
  0x11   :  { %366 = shalt.err (!%p363_p7)
}
  0x12   :  { %21 = dma.hbm_to_vmem [thread:$0]  %s494_s0, 128, %s19_s16, [#allocation3]  }
  0x13   :  { %s367_s5 = scalar_lea.hbm %s495_s1, 128 }
  0x14   :  { %p368_p8 = scmp.ne.s32.totalorder %s495_s1, %s367_s5  ;;  %p371_p9 = scmp.lt.u32.totalorder %s367_s5, %s495_s1 }
  0x16   :  { %p373_p10 = pnand %p371_p9, %p368_p8 }
  0x18   :  { %376 = shalt.err (!%p373_p10)
}
  0x19   :  { %s377_s10 = scalar_lea.vmem %s29_s18, 128  ;;  %p382_p12 = scmp.lt.s32.totalorder %s29_s18, %s29_s18 }
  0x1a   :  { %p378_p11 = scmp.ne.s32.totalorder %s29_s18, %s377_s10  ;;  %p383_p13 = scmp.lt.s32.totalorder %s377_s10, %s377_s10 }
  0x1c   :  { %p384_p0 = por %p383_p13, %p382_p12 }
  0x1e   :  { %p385_p1 = pnand %p384_p0, %p378_p11 }
  0x20   :  { %388 = shalt.err (!%p385_p1)
}
  0x21   :  { %31 = dma.hbm_to_vmem [thread:$0]  %s495_s1, 128, %s29_s18, [#allocation6]  }
  0x22   :  { %411 = dma.done.wait [#allocation3], 128  }
  0x23   :  { %412 = vsyncadd [#allocation3], 4294967168 }
  0x24   :  { %413 = dma.done.wait [#allocation6], 128  }
  0x25   :  { %414 = vsyncadd [#allocation6], 4294967168  ;;  %v419_v0 = vmov 0.0   ;;  %vm420_vm0 = vmmov 0   ;;  %vm46_vm1 = vcmask 261120   ;;  %v50_v1 = vld [vmem:[#allocation2] sm:$0xff]  ;;  %v281_v51 = vlaneseq }
  0x26   :  { %316 = vmatprep.subr.mxu0 %v419_v0  ;;  %321 = vmatprep.subr.mxu1 %v419_v0  ;;  %v151_v2 = vld [vmem:[#allocation5] sm:$0xff]  ;;  %v45_v3 = vmul.f32 %v50_v1, %v50_v1  ;;  %v308_v8 = vld [vmem:[%s496_s2] ss:$0 sm:$0xff]  ;;  %vm246_vm3 = vcmask 64512   ;;  %s421_s2 = smov [#allocation7]   ;;  %vm288_vm7 = vcmask 57344  }
  0x27   :  { %318 = vmatprep.mubr.msk.f32.mxu0 %vm420_vm0, %v419_v0  ;;  %323 = vmatprep.mubr.msk.f32.mxu1 %vm420_vm0, %v419_v0  ;;  %v147_v4 = vmul.f32 %v151_v2, %v151_v2  ;;  %v311_v9 = vld [vmem:[%s497_s3] ss:$0 sm:$0xff]  ;;  %v282_v55 = vand.u32 127, %v281_v51  ;;  %v284_v56 = vshrl.u32 %v281_v51, 7  ;;  %s296_s3 = sshll.u32 %s421_s2, 4  ;;  %s297_s3 = int_to_ptr.vmem [resolvable:$true] %s296_s3 }
  0x28   :  { %317 = vmatpush3.xpose.msk.msra.mxu0 %vm46_vm1, %v50_v1  ;;  %322 = vmatpush3.xpose.msk.msra.mxu1 %vm46_vm1, %v151_v2  ;;  %v47_v5 = vsel %vm46_vm1, %v45_v3, 0.0  ;;  %s389_s15 = scalar_lea.vmem %s297_s3, 16  ;;  %s393_s16 = scalar_lea.vmem %s297_s3, 32 }
  0x29   :  { %48 = vadd.xlane.f32.xlu0 %v47_v5  ;;  %v148_v6 = vsel %vm46_vm1, %v147_v4, 0.0  ;;  %v285_v62 = vsub.s32 %v282_v55, %v284_v56  ;;  %p390_p2 = scmp.ne.s32.totalorder %s297_s3, %s389_s15  ;;  %p394_p3 = scmp.lt.s32.totalorder %s297_s3, %s297_s3 }
  0x2a   :  { %p395_p4 = scmp.lt.s32.totalorder %s393_s16, %s389_s15 }
  0x2b   :  { %319 = vmatmul.mubr.msk.f32.vlgmr.msra.gmra.mrb[0].mxu0 %vm46_vm1, %v50_v1  ;;  %324 = vmatmul.mubr.msk.f32.vlgmr.msra.gmra.mrb[0].mxu1 %vm46_vm1, %v151_v2 }
  0x2c   :  { %p396_p5 = por %p395_p4, %p394_p3 }
  0x2d   :  { %149 = vadd.xlane.f32.xlu0 %v148_v6 }
  0x2e   :  { %p397_p6 = pnand %p396_p5, %p390_p2 }
  0xb6   :  { %v49_v7 = vpop.xlane.xlu0 %48 }
  0xb7   :  { %v134_v11 = vadd.f32 %v308_v8, %v49_v7 }
  0xba   :  { %v150_v10 = vpop.xlane.xlu0 %149 }
  0xbb   :  { %v235_v12 = vadd.f32 %v311_v9, %v150_v10 }
  0xfe   :  { %v123_v13 = vpop.f32.mrb[0].mxu0  ;;  %v224_v14 = vpop.f32.mrb[0].mxu1 }
  0xff   :  { %v135_v15 = vmul.f32 2.0, %v123_v13  ;;  %v236_v16 = vmul.f32 2.0, %v224_v14  ;;  %v320_v17 = vpop.f32.mrb[1].mxu0  ;;  %v325_v18 = vpop.f32.mrb[1].mxu1 }
 0x101   :  { %v136_v19 = vsub.f32 %v134_v11, %v135_v15  ;;  %v237_v20 = vsub.f32 %v235_v12, %v236_v16 }
 0x103   :  { %v137_v21 = vmax.f32 %v136_v19, 1e-12  ;;  %v238_v22 = vmax.f32 %v237_v20, 1e-12 }
 0x105   :  { %331 = vrsqrt.f32 %v137_v21  ;;  %vm140_vm2 = vcmp.eq.f32.partialorder %v137_v21, inf  ;;  %v143_v26 = vand.u32 2147483648, %v137_v21  ;;  %vm142_vm4 = vcmp.eq.f32.partialorder %v137_v21, 0.0 }
 0x106   :  { %333 = vrsqrt.f32 %v238_v22  ;;  %vm241_vm5 = vcmp.eq.f32.partialorder %v238_v22, inf  ;;  %v244_v31 = vand.u32 2147483648, %v238_v22  ;;  %vm243_vm6 = vcmp.eq.f32.partialorder %v238_v22, 0.0 }
 0x10f   :  { %v332_v23 = vpop.eup %331 }
 0x110   :  { %v334_v24 = vpop.eup %333  ;;  %v139_v25 = vmul.f32 %v332_v23, %v137_v21 }
 0x111   :  { %v240_v27 = vmul.f32 %v334_v24, %v238_v22 }
 0x112   :  { %v141_v28 = vsel %vm140_vm2, %v137_v21, %v139_v25 }
 0x113   :  { %v144_v29 = vsel %vm142_vm4, %v143_v26, %v141_v28  ;;  %v242_v30 = vsel %vm241_vm5, %v238_v22, %v240_v27 }
 0x114   :  { %v247_v32 = vsel %vm246_vm3, %v144_v29, -inf  ;;  %v245_v33 = vsel %vm243_vm6, %v244_v31, %v242_v30 }
 0x115   :  { %248 = vmax.xlane.f32.xlu1 %v247_v32  ;;  %v259_v34 = vsel %vm246_vm3, %v245_v33, -inf  ;;  %v271_v43 = vsub.f32 %v245_v33, %v144_v29 }
 0x119   :  { %260 = vmax.xlane.f32.xlu1 %v259_v34 }
 0x1a2   :  { %v249_v35 = vpop.xlane.xlu1 %248 }
 0x1a3   :  { %v250_v36 = vsub.f32 %v144_v29, %v249_v35 }
 0x1a5   :  { %v251_v37 = vmul.f32 1.442695, %v250_v36 }
 0x1a6   :  { %v261_v38 = vpop.xlane.xlu1 %260 }
 0x1a7   :  { %335 = vpow2.f32 %v251_v37  ;;  %v262_v39 = vsub.f32 %v245_v33, %v261_v38 }
 0x1a9   :  { %v263_v40 = vmul.f32 1.442695, %v262_v39 }
 0x1ab   :  { %337 = vpow2.f32 %v263_v40 }
 0x1b1   :  { %v336_v41 = vpop.eup %335 }
 0x1b2   :  { %v253_v42 = vsel %vm246_vm3, %v336_v41, 0.0 }
 0x1b3   :  { %254 = vadd.xlane.f32.xlu0 %v253_v42 }
 0x1b5   :  { %v338_v44 = vpop.eup %337 }
 0x1b6   :  { %v265_v45 = vsel %vm246_vm3, %v338_v44, 0.0  ;;  %v272_v46 = vmul.f32 %v338_v44, %v271_v43 }
 0x1b7   :  { %266 = vadd.xlane.f32.xlu1 %v265_v45 }
 0x1b8   :  { %v273_v47 = vsel %vm246_vm3, %v272_v46, 0.0 }
 0x1b9   :  { %274 = vadd.xlane.f32.xlu0 %v273_v47 }
 0x240   :  { %v255_v48 = vpop.xlane.xlu0 %254 }
 0x241   :  { %339 = vlog2.f32 %v255_v48 }
 0x244   :  { %v267_v49 = vpop.xlane.xlu1 %266 }
 0x245   :  { %341 = vlog2.f32 %v267_v49 }
 0x246   :  { %343 = vrcp.f32 %v267_v49  ;;  %v275_v60 = vpop.xlane.xlu0 %274 }
 0x24b   :  { %v340_v50 = vpop.eup %339 }
 0x24c   :  { %v257_v52 = vmul.f32 0.6931472, %v340_v50 }
 0x24e   :  { %v258_v58 = vadd.f32 %v257_v52, %v249_v35 }
 0x24f   :  { %v342_v53 = vpop.eup %341 }
 0x250   :  { %v269_v54 = vmul.f32 0.6931472, %v342_v53  ;;  %v344_v57 = vpop.eup %343 }
 0x251   :  { %v277_v63 = vmul.f32 %v344_v57, %v275_v60 }
 0x252   :  { %v270_v59 = vadd.f32 %v269_v54, %v261_v38 }
 0x254   :  { %v278_v61 = vsub.f32 %v258_v58, %v270_v59 }
 0x256   :  { %v279_v0 = vadd.f32 %v278_v61, %v277_v63 }
 0x258   :  { %v286_v1 = vrot.slane %v279_v0, %v285_v62 }
 0x25a   :  { %289 = vst.msk [vmem:[#allocation7] sm:$0x1] %vm288_vm7, %v286_v1 }
 0x25b   :  { %400 = shalt.err (!%p397_p6)
}
 0x25c   :  { %s401_s19 = scalar_lea.hbm %s498_s4, 16 }
 0x25d   :  { %p402_p7 = scmp.ne.s32.totalorder %s498_s4, %s401_s19  ;;  %p405_p8 = scmp.lt.u32.totalorder %s401_s19, %s498_s4 }
 0x25f   :  { %p407_p9 = pnand %p405_p8, %p402_p7 }
 0x261   :  { %410 = shalt.err (!%p407_p9)
}
 0x262   :  { %299 = dma.vmem_to_hbm [thread:$0]  %s297_s3, 16, %s498_s4, [#allocation4]  }
 0x263   :  { %415 = dma.done.wait [#allocation4], 16  }
 0x264   :  { %416 = vsyncadd [#allocation4], 4294967280 }
 0x265   :  { %303 = vsyncpa [#allocation3], 1 }
 0x266   :  { %304 = vsyncpa [#allocation6], 1 }
 0x267   :  { %305 = vsyncpa [#allocation4], 1 }

// kernel: tpu_custom_call.1
= control target key start
LH: loop header
LB: loop body
LE: loop exit
PB: predicated region body
PF: predicated region fallthrough
CT: control target
= control target key end

     0   :  { %9 = vsyncpa [#allocation3], 0  ;;  %s494_s0 = inlined_call_operand.hbm [shape: f32[8,32], index: 0, kind: input, shape index: {}]   ;;  %s495_s1 = inlined_call_operand.hbm [shape: f32[8,32], index: 1, kind: input, shape index: {}]   ;;  %s496_s2 = inlined_call_operand.vmem [shape: f32[1,8], index: 2, kind: input, shape index: {}]   ;;  %s497_s3 = inlined_call_operand.vmem [shape: f32[1,8], index: 3, kind: input, shape index: {}]   ;;  %s498_s4 = inlined_call_operand.hbm [shape: f32[1,1,8], index: 4, kind: output, shape index: {}]  }
   0x1   :  { %10 = vsyncpa [#allocation6], 0 }
   0x2   :  { %11 = vsyncpa [#allocation4], 0  ;;  %s417_s15 = smov [#allocation2]   ;;  %s418_s17 = smov [#allocation5]  }
   0x3   :  { %s18_s16 = sshll.u32 %s417_s15, 4  ;;  %s28_s18 = sshll.u32 %s418_s17, 4  ;;  %s19_s16 = int_to_ptr.vmem [resolvable:$true] %s18_s16  ;;  %s29_s18 = int_to_ptr.vmem [resolvable:$true] %s28_s18 }
   0x4   :  { %s345_s21 = scalar_lea.hbm %s494_s0, 128 }
   0x5   :  { %p346_p0 = scmp.ne.s32.totalorder %s494_s0, %s345_s21  ;;  %p349_p1 = scmp.lt.u32.totalorder %s345_s21, %s494_s0 }
   0x7   :  { %p351_p2 = pnand %p349_p1, %p346_p0 }
   0x9   :  { %354 = shalt.err (!%p351_p2)
}
   0xa   :  { %s355_s26 = scalar_lea.vmem %s19_s16, 128  ;;  %p360_p4 = scmp.lt.s32.totalorder %s19_s16, %s19_s16 }
   0xb   :  { %p356_p3 = scmp.ne.s32.totalorder %s19_s16, %s355_s26  ;;  %p361_p5 = scmp.lt.s32.totalorder %s355_s26, %s355_s26 }
   0xd   :  { %p362_p6 = por %p361_p5, %p360_p4 }
   0xf   :  { %p363_p7 = pnand %p362_p6, %p356_p3 }
  0x11   :  { %366 = shalt.err (!%p363_p7)
}
  0x12   :  { %21 = dma.hbm_to_vmem [thread:$0]  %s494_s0, 128, %s19_s16, [#allocation3]  }
  0x13   :  { %s367_s5 = scalar_lea.hbm %s495_s1, 128 }
  0x14   :  { %p368_p8 = scmp.ne.s32.totalorder %s495_s1, %s367_s5  ;;  %p371_p9 = scmp.lt.u32.totalorder %s367_s5, %s495_s1 }
  0x16   :  { %p373_p10 = pnand %p371_p9, %p368_p8 }
  0x18   :  { %376 = shalt.err (!%p373_p10)
}
  0x19   :  { %s377_s10 = scalar_lea.vmem %s29_s18, 128  ;;  %p382_p12 = scmp.lt.s32.totalorder %s29_s18, %s29_s18 }
  0x1a   :  { %p378_p11 = scmp.ne.s32.totalorder %s29_s18, %s377_s10  ;;  %p383_p13 = scmp.lt.s32.totalorder %s377_s10, %s377_s10 }
  0x1c   :  { %p384_p0 = por %p383_p13, %p382_p12 }
  0x1e   :  { %p385_p1 = pnand %p384_p0, %p378_p11 }
  0x20   :  { %388 = shalt.err (!%p385_p1)
}
  0x21   :  { %31 = dma.hbm_to_vmem [thread:$0]  %s495_s1, 128, %s29_s18, [#allocation6]  }
  0x22   :  { %411 = dma.done.wait [#allocation3], 128  }
  0x23   :  { %412 = vsyncadd [#allocation3], 4294967168 }
  0x24   :  { %413 = dma.done.wait [#allocation6], 128  }
  0x25   :  { %414 = vsyncadd [#allocation6], 4294967168  ;;  %v419_v0 = vmov 0.0   ;;  %vm420_vm0 = vmmov 0   ;;  %vm46_vm1 = vcmask 261120   ;;  %v50_v1 = vld [vmem:[#allocation2] sm:$0xff]  ;;  %v281_v51 = vlaneseq }
  0x26   :  { %316 = vmatprep.subr.mxu0 %v419_v0  ;;  %321 = vmatprep.subr.mxu1 %v419_v0  ;;  %v151_v2 = vld [vmem:[#allocation5] sm:$0xff]  ;;  %v45_v3 = vmul.f32 %v50_v1, %v50_v1  ;;  %v308_v8 = vld [vmem:[%s496_s2] ss:$0 sm:$0xff]  ;;  %vm246_vm3 = vcmask 64512   ;;  %s421_s2 = smov [#allocation7]   ;;  %vm288_vm7 = vcmask 57344  }
  0x27   :  { %318 = vmatprep.mubr.msk.f32.mxu0 %vm420_vm0, %v419_v0  ;;  %323 = vmatprep.mubr.msk.f32.mxu1 %vm420_vm0, %v419_v0  ;;  %v147_v4 = vmul.f32 %v151_v2, %v151_v2  ;;  %v311_v9 = vld [vmem:[%s497_s3] ss:$0 sm:$0xff]  ;;  %v282_v55 = vand.u32 127, %v281_v51  ;;  %v284_v56 = vshrl.u32 %v281_v51, 7  ;;  %s296_s3 = sshll.u32 %s421_s2, 4  ;;  %s297_s3 = int_to_ptr.vmem [resolvable:$true] %s296_s3 }
  0x28   :  { %317 = vmatpush3.xpose.msk.msra.mxu0 %vm46_vm1, %v50_v1  ;;  %322 = vmatpush3.xpose.msk.msra.mxu1 %vm46_vm1, %v151_v2  ;;  %v47_v5 = vsel %vm46_vm1, %v45_v3, 0.0  ;;  %s389_s15 = scalar_lea.vmem %s297_s3, 16  ;;  %s393_s16 = scalar_lea.vmem %s297_s3, 32 }
  0x29   :  { %48 = vadd.xlane.f32.xlu0 %v47_v5  ;;  %v148_v6 = vsel %vm46_vm1, %v147_v4, 0.0  ;;  %v285_v62 = vsub.s32 %v282_v55, %v284_v56  ;;  %p390_p2 = scmp.ne.s32.totalorder %s297_s3, %s389_s15  ;;  %p394_p3 = scmp.lt.s32.totalorder %s297_s3, %s297_s3 }
  0x2a   :  { %p395_p4 = scmp.lt.s32.totalorder %s393_s16, %s389_s15 }
  0x2b   :  { %319 = vmatmul.mubr.msk.f32.vlgmr.msra.gmra.mrb[0].mxu0 %vm46_vm1, %v50_v1  ;;  %324 = vmatmul.mubr.msk.f32.vlgmr.msra.gmra.mrb[0].mxu1 %vm46_vm1, %v151_v2 }
  0x2c   :  { %p396_p5 = por %p395_p4, %p394_p3 }
  0x2d   :  { %149 = vadd.xlane.f32.xlu0 %v148_v6 }
  0x2e   :  { %p397_p6 = pnand %p396_p5, %p390_p2 }
  0xb6   :  { %v49_v7 = vpop.xlane.xlu0 %48 }
  0xb7   :  { %v134_v11 = vadd.f32 %v308_v8, %v49_v7 }
  0xba   :  { %v150_v10 = vpop.xlane.xlu0 %149 }
  0xbb   :  { %v235_v12 = vadd.f32 %v311_v9, %v150_v10 }
  0xfe   :  { %v123_v13 = vpop.f32.mrb[0].mxu0  ;;  %v224_v14 = vpop.f32.mrb[0].mxu1 }
  0xff   :  { %v135_v15 = vmul.f32 2.0, %v123_v13  ;;  %v236_v16 = vmul.f32 2.0, %v224_v14  ;;  %v320_v17 = vpop.f32.mrb[1].mxu0  ;;  %v325_v18 = vpop.f32.mrb[1].mxu1 }
 0x101   :  { %v136_v19 = vsub.f32 %v134_v11, %v135_v15  ;;  %v237_v20 = vsub.f32 %v235_v12, %v236_v16 }
 0x103   :  { %v137_v21 = vmax.f32 %v136_v19, 1e-12  ;;  %v238_v22 = vmax.f32 %v237_v20, 1e-12 }
 0x105   :  { %331 = vrsqrt.f32 %v137_v21  ;;  %vm140_vm2 = vcmp.eq.f32.partialorder %v137_v21, inf  ;;  %v143_v26 = vand.u32 2147483648, %v137_v21  ;;  %vm142_vm4 = vcmp.eq.f32.partialorder %v137_v21, 0.0 }
 0x106   :  { %333 = vrsqrt.f32 %v238_v22  ;;  %vm241_vm5 = vcmp.eq.f32.partialorder %v238_v22, inf  ;;  %v244_v31 = vand.u32 2147483648, %v238_v22  ;;  %vm243_vm6 = vcmp.eq.f32.partialorder %v238_v22, 0.0 }
 0x10f   :  { %v332_v23 = vpop.eup %331 }
 0x110   :  { %v334_v24 = vpop.eup %333  ;;  %v139_v25 = vmul.f32 %v332_v23, %v137_v21 }
 0x111   :  { %v240_v27 = vmul.f32 %v334_v24, %v238_v22 }
 0x112   :  { %v141_v28 = vsel %vm140_vm2, %v137_v21, %v139_v25 }
 0x113   :  { %v144_v29 = vsel %vm142_vm4, %v143_v26, %v141_v28  ;;  %v242_v30 = vsel %vm241_vm5, %v238_v22, %v240_v27 }
 0x114   :  { %v247_v32 = vsel %vm246_vm3, %v144_v29, -inf  ;;  %v245_v33 = vsel %vm243_vm6, %v244_v31, %v242_v30 }
 0x115   :  { %248 = vmax.xlane.f32.xlu1 %v247_v32  ;;  %v259_v34 = vsel %vm246_vm3, %v245_v33, -inf  ;;  %v271_v43 = vsub.f32 %v245_v33, %v144_v29 }
 0x119   :  { %260 = vmax.xlane.f32.xlu1 %v259_v34 }
 0x1a2   :  { %v249_v35 = vpop.xlane.xlu1 %248 }
 0x1a3   :  { %v250_v36 = vsub.f32 %v144_v29, %v249_v35 }
 0x1a5   :  { %v251_v37 = vmul.f32 1.442695, %v250_v36 }
 0x1a6   :  { %v261_v38 = vpop.xlane.xlu1 %260 }
 0x1a7   :  { %335 = vpow2.f32 %v251_v37  ;;  %v262_v39 = vsub.f32 %v245_v33, %v261_v38 }
 0x1a9   :  { %v263_v40 = vmul.f32 1.442695, %v262_v39 }
 0x1ab   :  { %337 = vpow2.f32 %v263_v40 }
 0x1b1   :  { %v336_v41 = vpop.eup %335 }
 0x1b2   :  { %v253_v42 = vsel %vm246_vm3, %v336_v41, 0.0 }
 0x1b3   :  { %254 = vadd.xlane.f32.xlu0 %v253_v42 }
 0x1b5   :  { %v338_v44 = vpop.eup %337 }
 0x1b6   :  { %v265_v45 = vsel %vm246_vm3, %v338_v44, 0.0  ;;  %v272_v46 = vmul.f32 %v338_v44, %v271_v43 }
 0x1b7   :  { %266 = vadd.xlane.f32.xlu1 %v265_v45 }
 0x1b8   :  { %v273_v47 = vsel %vm246_vm3, %v272_v46, 0.0 }
 0x1b9   :  { %274 = vadd.xlane.f32.xlu0 %v273_v47 }
 0x240   :  { %v255_v48 = vpop.xlane.xlu0 %254 }
 0x241   :  { %339 = vlog2.f32 %v255_v48 }
 0x244   :  { %v267_v49 = vpop.xlane.xlu1 %266 }
 0x245   :  { %341 = vlog2.f32 %v267_v49 }
 0x246   :  { %343 = vrcp.f32 %v267_v49  ;;  %v275_v60 = vpop.xlane.xlu0 %274 }
 0x24b   :  { %v340_v50 = vpop.eup %339 }
 0x24c   :  { %v257_v52 = vmul.f32 0.6931472, %v340_v50 }
 0x24e   :  { %v258_v58 = vadd.f32 %v257_v52, %v249_v35 }
 0x24f   :  { %v342_v53 = vpop.eup %341 }
 0x250   :  { %v269_v54 = vmul.f32 0.6931472, %v342_v53  ;;  %v344_v57 = vpop.eup %343 }
 0x251   :  { %v277_v63 = vmul.f32 %v344_v57, %v275_v60 }
 0x252   :  { %v270_v59 = vadd.f32 %v269_v54, %v261_v38 }
 0x254   :  { %v278_v61 = vsub.f32 %v258_v58, %v270_v59 }
 0x256   :  { %v279_v0 = vadd.f32 %v278_v61, %v277_v63 }
 0x258   :  { %v286_v1 = vrot.slane %v279_v0, %v285_v62 }
 0x25a   :  { %289 = vst.msk [vmem:[#allocation7] sm:$0x1] %vm288_vm7, %v286_v1 }
 0x25b   :  { %400 = shalt.err (!%p397_p6)
}
 0x25c   :  { %s401_s19 = scalar_lea.hbm %s498_s4, 16 }
 0x25d   :  { %p402_p7 = scmp.ne.s32.totalorder %s498_s4, %s401_s19  ;;  %p405_p8 = scmp.lt.u32.totalorder %s401_s19, %s498_s4 }
 0x25f   :  { %p407_p9 = pnand %p405_p8, %p402_p7 }
 0x261   :  { %410 = shalt.err (!%p407_p9)
}
 0x262   :  { %299 = dma.vmem_to_hbm [thread:$0]  %s297_s3, 16, %s498_s4, [#allocation4]  }
 0x263   :  { %415 = dma.done.wait [#allocation4], 16  }
 0x264   :  { %416 = vsyncadd [#allocation4], 4294967280 }
 0x265   :  { %303 = vsyncpa [#allocation3], 1 }
 0x266   :  { %304 = vsyncpa [#allocation6], 1 }
 0x267   :  { %305 = vsyncpa [#allocation4], 1 }

</bundles_post_ra>
